<compile_context>
chip_gen: v7x
topology: tpu7x:2x2x1
jax: 0.10.0
libtpu: 0.0.40
codegen_flags: <defaults>
</compile_context>

<pallas_src>
import jax
import jax.numpy as jnp
from jax.experimental import pallas as pl
from jax.experimental.pallas import tpu as pltpu


def _round_up(x: int, m: int) -> int:
    return (x + m - 1) // m * m


def _vmem_limit_bytes() -> int:
    """Scoped-VMEM budget: generous on 128-MiB chips, conservative on v7x (64 MiB)."""
    try:
        cap = pltpu.get_tpu_info().vmem_capacity_bytes
    except Exception:
        cap = 64 * 1024 * 1024  # assume the smallest (v7x per-TC) if query fails
    if cap >= 100 * 1024 * 1024:      # v5e / v6e: 128 MiB physical
        return 96 * 1024 * 1024
    return 48 * 1024 * 1024           # v7x: 64 MiB per TensorCore


def _linear_kernel(x_ref, w_ref, b_ref, o_ref, acc_ref):
    # x_ref: (tm, tk), w_ref: (tk, tn), b_ref: (1, tn), o_ref: (tm, tn)
    # acc_ref: (tm, tn) f32 scratch, resident across the K (reduction) axis.
    k = pl.program_id(2)

    prod = jnp.dot(x_ref[...], w_ref[...], preferred_element_type=jnp.float32)

    @pl.when(k == 0)
    def _():
        # Direct write on the first K step: no zero-init + accumulate RMW pass.
        acc_ref[...] = prod

    @pl.when(k > 0)
    def _():
        acc_ref[...] += prod

    @pl.when(k == pl.num_programs(2) - 1)
    def _():
        acc = acc_ref[...] + b_ref[...].astype(jnp.float32)
        o_ref[...] = acc.astype(o_ref.dtype)


def prepare_linear_head_params(w, b=None, *, compute_dtype=jnp.bfloat16,
                               tn=512, tk=1024):
    """Pad + cast the parameters ONCE (call at init, not per forward step).

    w : (d_out, d_in)  -- PyTorch nn.Linear `fc.weight` layout.
    b : (d_out,) or None.
    compute_dtype : MXU operand dtype (bf16 recommended; f32 for exact math).
    """
    d_out, d_in = w.shape
    compute_dtype = jnp.dtype(compute_dtype)

    # Lane-dense tiles (multiples of 128; defaults are multiples of 256 so the
    # 2x256x256 MXU on v6e/v7x sees full-width passes for real problem sizes).
    tn_ = min(tn, _round_up(d_out, 128))
    tk_ = min(tk, _round_up(d_in, 128))
    n_pad = _round_up(d_out, tn_)
    k_pad = _round_up(d_in, tk_)

    w_t = jnp.asarray(w).T.astype(compute_dtype)          # (d_in, d_out)
    if (k_pad, n_pad) != (d_in, d_out):
        # Zero-padding K keeps the dot exact; padded N lanes are sliced off
        # in linear_head before they could leak.
        w_t = jnp.pad(w_t, ((0, k_pad - d_in), (0, n_pad - d_out)))

    if b is None:
        b_p = jnp.zeros((1, n_pad), jnp.float32)
    else:
        b_p = jnp.asarray(b, jnp.float32).reshape(1, d_out)
        if n_pad != d_out:
            b_p = jnp.pad(b_p, ((0, 0), (0, n_pad - d_out)))

    return dict(w_p=w_t, b_p=b_p, d_in=d_in, d_out=d_out,
                n_pad=n_pad, k_pad=k_pad, tn=tn_, tk=tk_,
                compute_dtype=compute_dtype)


def linear_head(x, params, *, tm=512, out_dtype=None):
    """y = fc(x) with pre-prepared (padded / cast) params from
    prepare_linear_head_params.  x: (..., d_in) -> (..., d_out)."""
    d_in, d_out = params["d_in"], params["d_out"]
    assert x.shape[-1] == d_in, (x.shape, d_in)
    lead = x.shape[:-1]
    m = 1
    for s in lead:
        m *= s

    compute_dtype = params["compute_dtype"]
    k_pad, n_pad = params["k_pad"], params["n_pad"]
    tn_, tk_ = params["tn"], params["tk"]
    w_p, b_p = params["w_p"], params["b_p"]
    out_dtype = jnp.dtype(x.dtype if out_dtype is None else out_dtype)

    # Sublane granularity depends on the compute dtype packing (f32:8, bf16:16).
    comp_itemsize = compute_dtype.itemsize
    sublane = max(8, 32 // comp_itemsize)
    tm_ = min(tm, _round_up(m, sublane))
    m_pad = _round_up(m, tm_)

    # Cast first (halves any pad traffic for bf16), pad only if needed.
    x2 = x.reshape(m, d_in).astype(compute_dtype)
    if (m_pad, k_pad) != (m, d_in):
        x2 = jnp.pad(x2, ((0, m_pad - m), (0, k_pad - d_in)))

    grid = (m_pad // tm_, n_pad // tn_, k_pad // tk_)

    # Actual HBM traffic: x is re-read once per N tile, W once per M tile.
    out_itemsize = out_dtype.itemsize
    bytes_accessed = (x2.size * comp_itemsize * grid[1]
                      + w_p.size * comp_itemsize * grid[0]
                      + b_p.size * b_p.dtype.itemsize * grid[0]
                      + m_pad * n_pad * out_itemsize)

    # NOTE: if profiling ever shows exposed DMA on the W stream, deepen its
    # pipeline with pipeline_mode=pl.Buffered(3) on the second in_spec
    # (check VMEM headroom on v7x first).
    out = pl.pallas_call(
        _linear_kernel,
        out_shape=jax.ShapeDtypeStruct((m_pad, n_pad), out_dtype),
        grid_spec=pltpu.PrefetchScalarGridSpec(
            num_scalar_prefetch=0,
            grid=grid,
            in_specs=[
                pl.BlockSpec((tm_, tk_), lambda i, j, k: (i, k)),
                pl.BlockSpec((tk_, tn_), lambda i, j, k: (k, j)),
                pl.BlockSpec((1, tn_), lambda i, j, k: (0, j)),
            ],
            out_specs=pl.BlockSpec((tm_, tn_), lambda i, j, k: (i, j)),
            scratch_shapes=[pltpu.VMEM((tm_, tn_), jnp.float32)],
        ),
        compiler_params=pltpu.CompilerParams(
            dimension_semantics=("parallel", "parallel", "arbitrary"),
            vmem_limit_bytes=_vmem_limit_bytes(),
        ),
        cost_estimate=pl.CostEstimate(
            flops=2 * m_pad * k_pad * n_pad,
            transcendentals=0,
            bytes_accessed=bytes_accessed,
        ),
    )(x2, w_p, b_p)

    # Fast path: skip the extra HBM pass over the logits when already aligned.
    if (m_pad, n_pad) != (m, d_out):
        out = out[:m, :d_out]
    return out.reshape(*lead, d_out)


def linear_head_dense(x, w, b, *, compute_dtype=jnp.bfloat16, tm=512, tn=512, tk=1024):
    """One-shot convenience wrapper (pads/casts the weight per call; prefer
    prepare_linear_head_params + linear_head for repeated use)."""
    params = prepare_linear_head_params(w, b, compute_dtype=compute_dtype, tn=tn, tk=tk)
    return linear_head(x, params, tm=tm)


if __name__ == "__main__":
    # Small shapes implied by the module: batch=2, seq=8, d_in=32, d_out=16.
    B, S, D_IN, D_OUT = 2, 8, 32, 16

    key = jax.random.PRNGKey(0)
    kx, kw, kb = jax.random.split(key, 3)

    # Deterministic parameter init (PyTorch nn.Linear-style uniform bound).
    bound = 1.0 / (D_IN ** 0.5)
    w = jax.random.uniform(kw, (D_OUT, D_IN), jnp.float32, -bound, bound)  # fc.weight
    b = jax.random.uniform(kb, (D_OUT,), jnp.float32, -bound, bound)       # fc.bias
    x = jax.random.normal(kx, (B, S, D_IN), jnp.float32)

    # Reference (same math as PyTorch F.linear).
    y_ref = x @ w.T + b

    # 1) f32 compute path -- exact numerical check of the kernel structure.
    params_f32 = prepare_linear_head_params(w, b, compute_dtype=jnp.float32)
    y_f32 = linear_head(x, params_f32)
    jax.block_until_ready(y_f32)
    assert y_f32.shape == (B, S, D_OUT)
    assert jnp.allclose(y_f32, y_ref, atol=1e-5, rtol=1e-5)

    # 2) bf16 MXU path (recommended for LM-head-shaped problems) -- weights
    #    prepared once, looser tolerance appropriate for bf16 operands.
    params_bf16 = prepare_linear_head_params(w, b, compute_dtype=jnp.bfloat16)
    y_bf16 = linear_head(x, params_bf16)
    jax.block_until_ready(y_bf16)
    assert y_bf16.shape == (B, S, D_OUT)
    assert y_bf16.dtype == x.dtype
    assert jnp.allclose(y_bf16, y_ref, atol=3e-2, rtol=3e-2)

    print("KERNEL_OK")
</pallas_src>

<mosaic_0001>
module attributes {stable_mosaic.version = 11 : i64} {
  func.func @_linear_kernel(%arg0: i32, %arg1: i32, %arg2: i32, %arg3: memref<16x128xf32, #tpu.memory_space<vmem>>, %arg4: memref<128x128xf32, #tpu.memory_space<vmem>>, %arg5: memref<1x128xf32, #tpu.memory_space<vmem>>, %arg6: memref<16x128xf32, #tpu.memory_space<vmem>>, %arg7: memref<16x128xf32, #tpu.memory_space<vmem>>) attributes {dimension_semantics = [#tpu.dimension_semantics<parallel>, #tpu.dimension_semantics<parallel>, #tpu.dimension_semantics<arbitrary>], iteration_bounds = array<i64: 1, 1, 1>, scalar_prefetch = 0 : i64, scratch_operands = 1 : i64, tpu.core_type = #tpu.core_type<tc>, window_params = [{transform_indices = @transform_0, window_bounds = array<i64: 16, 128>}, {transform_indices = @transform_1, window_bounds = array<i64: 128, 128>}, {transform_indices = @transform_2, window_bounds = array<i64: 1, 128>}, {transform_indices = @transform_3, window_bounds = array<i64: 16, 128>}]} {
    %c0 = arith.constant 0 : index
    %c0_0 = arith.constant 0 : index
    %0 = vector.load %arg3[%c0, %c0_0] : memref<16x128xf32, #tpu.memory_space<vmem>>, vector<16x128xf32>
    %c0_1 = arith.constant 0 : index
    %c0_2 = arith.constant 0 : index
    %1 = vector.load %arg4[%c0_1, %c0_2] : memref<128x128xf32, #tpu.memory_space<vmem>>, vector<128x128xf32>
    %cst = arith.constant dense<0.000000e+00> : vector<16x128xf32>
    %2 = tpu.matmul %0, %1, %cst {dimension_numbers = #tpu.dot_dimension_numbers<[1], [0], [0], [1], [0, 0, 1, 1], [], []>} : vector<16x128xf32>, vector<128x128xf32>, vector<16x128xf32> -> vector<16x128xf32>
    %c0_i32 = arith.constant 0 : i32
    %3 = arith.cmpi eq, %arg2, %c0_i32 : i32
    %4 = arith.extui %3 : i1 to i32
    %c0_i32_3 = arith.constant 0 : i32
    %5 = arith.cmpi ne, %4, %c0_i32_3 : i32
    scf.if %5 {
      %c0_8 = arith.constant 0 : index
      %c0_9 = arith.constant 0 : index
      %12 = vector.load %arg7[%c0_8, %c0_9] : memref<16x128xf32, #tpu.memory_space<vmem>>, vector<16x128xf32>
      tpu.vector_store %arg7[%c0_8, %c0_9], %2 {strides = array<i32>} : memref<16x128xf32, #tpu.memory_space<vmem>>, vector<16x128xf32>,
    } else {
    }
    %c0_i32_4 = arith.constant 0 : i32
    %6 = arith.cmpi sgt, %arg2, %c0_i32_4 : i32
    %7 = arith.extui %6 : i1 to i32
    %c0_i32_5 = arith.constant 0 : i32
    %8 = arith.cmpi ne, %7, %c0_i32_5 : i32
    scf.if %8 {
      %c0_8 = arith.constant 0 : index
      %c0_9 = arith.constant 0 : index
      %12 = vector.load %arg7[%c0_8, %c0_9] : memref<16x128xf32, #tpu.memory_space<vmem>>, vector<16x128xf32>
      %13 = arith.addf %12, %2 : vector<16x128xf32>
      %c0_10 = arith.constant 0 : index
      %c0_11 = arith.constant 0 : index
      %14 = vector.load %arg7[%c0_10, %c0_11] : memref<16x128xf32, #tpu.memory_space<vmem>>, vector<16x128xf32>
      tpu.vector_store %arg7[%c0_10, %c0_11], %13 {strides = array<i32>} : memref<16x128xf32, #tpu.memory_space<vmem>>, vector<16x128xf32>,
    } else {
    }
    %c0_i32_6 = arith.constant 0 : i32
    %9 = arith.cmpi eq, %arg2, %c0_i32_6 : i32
    %10 = arith.extui %9 : i1 to i32
    %c0_i32_7 = arith.constant 0 : i32
    %11 = arith.cmpi ne, %10, %c0_i32_7 : i32
    scf.if %11 {
      %c0_8 = arith.constant 0 : index
      %c0_9 = arith.constant 0 : index
      %12 = vector.load %arg7[%c0_8, %c0_9] : memref<16x128xf32, #tpu.memory_space<vmem>>, vector<16x128xf32>
      %c0_10 = arith.constant 0 : index
      %c0_11 = arith.constant 0 : index
      %13 = vector.load %arg5[%c0_10, %c0_11] : memref<1x128xf32, #tpu.memory_space<vmem>>, vector<1x128xf32>
      %14 = vector.broadcast %13 : vector<1x128xf32> to vector<16x128xf32>
      %15 = arith.addf %12, %14 : vector<16x128xf32>
      %c0_12 = arith.constant 0 : index
      %c0_13 = arith.constant 0 : index
      %16 = vector.load %arg6[%c0_12, %c0_13] : memref<16x128xf32, #tpu.memory_space<vmem>>, vector<16x128xf32>
      tpu.vector_store %arg6[%c0_12, %c0_13], %15 {strides = array<i32>} : memref<16x128xf32, #tpu.memory_space<vmem>>, vector<16x128xf32>,
    } else {
    }
    return
  }
  func.func @transform_0(%arg0: i32, %arg1: i32, %arg2: i32) -> (i32, i32) {
    %c0_i32 = arith.constant 0 : i32
    return %arg0, %arg2 : i32, i32
  }
  func.func @transform_1(%arg0: i32, %arg1: i32, %arg2: i32) -> (i32, i32) {
    %c0_i32 = arith.constant 0 : i32
    return %arg2, %arg1 : i32, i32
  }
  func.func @transform_2(%arg0: i32, %arg1: i32, %arg2: i32) -> (i32, i32) {
    %c0_i32 = arith.constant 0 : i32
    %c0_i32_0 = arith.constant 0 : i32
    return %c0_i32, %arg1 : i32, i32
  }
  func.func @transform_3(%arg0: i32, %arg1: i32, %arg2: i32) -> (i32, i32) {
    %c0_i32 = arith.constant 0 : i32
    return %arg0, %arg1 : i32, i32
  }
}

</mosaic_0001>

<bundles_post_ra>
// kernel: tpu_custom_call.1
= control target key start
LH: loop header
LB: loop body
LE: loop exit
PB: predicated region body
PF: predicated region fallthrough
CT: control target
= control target key end

     0   :  { %8 = vsyncpa [#allocation4], 0  ;;  %s422_s0 = inlined_call_operand.hbm [shape: f32[16,128], index: 0, kind: input, shape index: {}]   ;;  %s423_s1 = inlined_call_operand.hbm [shape: f32[128,128], index: 1, kind: input, shape index: {}]   ;;  %s424_s2 = inlined_call_operand.vmem [shape: f32[1,128], index: 2, kind: input, shape index: {}]   ;;  %s425_s3 = inlined_call_operand.hbm [shape: f32[16,128], index: 3, kind: output, shape index: {}]  }
   0x1   :  { %9 = vsyncpa [#allocation7], 0 }
   0x2   :  { %10 = vsyncpa [#allocation5], 0  ;;  %s349_s12 = smov [#allocation3]   ;;  %s277_s16 = scalar_lea.hbm %s422_s0, 256 }
   0x3   :  { %s16_s13 = sshll.u32 %s349_s12, 4  ;;  %p278_p0 = scmp.ne.s32.totalorder %s422_s0, %s277_s16  ;;  %s17_s13 = int_to_ptr.vmem [resolvable:$true] %s16_s13 }
   0x4   :  { %p281_p1 = scmp.lt.u32.totalorder %s277_s16, %s422_s0 }
   0x6   :  { %p283_p2 = pnand %p281_p1, %p278_p0 }
   0x8   :  { %286 = shalt.err (!%p283_p2)
}
   0x9   :  { %s287_s21 = scalar_lea.vmem %s17_s13, 256  ;;  %p292_p4 = scmp.lt.s32.totalorder %s17_s13, %s17_s13 }
   0xa   :  { %p288_p3 = scmp.ne.s32.totalorder %s17_s13, %s287_s21  ;;  %p293_p5 = scmp.lt.s32.totalorder %s287_s21, %s287_s21 }
   0xc   :  { %p294_p6 = por %p293_p5, %p292_p4 }
   0xe   :  { %p295_p7 = pnand %p294_p6, %p288_p3 }
  0x10   :  { %298 = shalt.err (!%p295_p7)
}
  0x11   :  { %s350_s22 = smov 128   ;;  %s351_s23 = smov 8  }
  0x12   :  { %22 = dma.hbm_to_vmem [thread:$0]  %s422_s0, 256, %s17_s13, [#allocation4], %s350_s22, %s350_s22, %s351_s23  }
  0x13   :  { %s352_s26 = smov [#allocation6]   ;;  %s299_s30 = scalar_lea.hbm %s423_s1, 2048 }
  0x14   :  { %s28_s27 = sshll.u32 %s352_s26, 4  ;;  %p300_p8 = scmp.ne.s32.totalorder %s423_s1, %s299_s30  ;;  %s29_s27 = int_to_ptr.vmem [resolvable:$true] %s28_s27 }
  0x15   :  { %p303_p9 = scmp.lt.u32.totalorder %s299_s30, %s423_s1 }
  0x17   :  { %p305_p10 = pnand %p303_p9, %p300_p8 }
  0x19   :  { %308 = shalt.err (!%p305_p10)
}
  0x1a   :  { %s309_s8 = scalar_lea.vmem %s29_s27, 2048  ;;  %p314_p12 = scmp.lt.s32.totalorder %s29_s27, %s29_s27 }
  0x1b   :  { %p310_p11 = scmp.ne.s32.totalorder %s29_s27, %s309_s8  ;;  %p315_p13 = scmp.lt.s32.totalorder %s309_s8, %s309_s8 }
  0x1d   :  { %p316_p0 = por %p315_p13, %p314_p12 }
  0x1f   :  { %p317_p1 = pnand %p316_p0, %p310_p11 }
  0x21   :  { %320 = shalt.err (!%p317_p1)
}
  0x22   :  { %34 = dma.hbm_to_vmem [thread:$0]  %s423_s1, 2048, %s29_s27, [#allocation7], %s350_s22, %s350_s22, %s351_s23  }
  0x23   :  { %343 = dma.done.wait [#allocation4], 256  }
  0x24   :  { %344 = vsyncadd [#allocation4], 4294967040 }
  0x25   :  { %345 = dma.done.wait [#allocation7], 2048  }
  0x26   :  { %346 = vsyncadd [#allocation7], 4294965248  ;;  %v45_v0 = vld [vmem:[#allocation6] sm:$0xff]  ;;  %v46_v1 = vld [vmem:[#allocation6 + $0x8] sm:$0xff]  ;;  %s353_s11 = smov [#allocation8]  }
  0x27   :  { %v47_v2 = vld [vmem:[#allocation6 + $0x10] sm:$0xff]  ;;  %v240_v3 = vpack.c.bf16 %v46_v1, %v45_v0  ;;  %v48_v4 = vld [vmem:[#allocation6 + $0x18] sm:$0xff]  ;;  %v49_v6 = vld [vmem:[#allocation6 + $0x20] sm:$0xff]  ;;  %s173_s12 = sshll.u32 %s353_s11, 4  ;;  %s174_s12 = int_to_ptr.vmem [resolvable:$true] %s173_s12 }
  0x28   :  { %v244_v5 = vpack.c.bf16 %v48_v4, %v47_v2  ;;  %v50_v7 = vld [vmem:[#allocation6 + $0x28] sm:$0xff]  ;;  %v43_v9 = vld [vmem:[#allocation3] sm:$0xff]  ;;  %v52_v11 = vld [vmem:[#allocation6 + $0x38] sm:$0xff]  ;;  %s321_s13 = scalar_lea.vmem %s174_s12, 256  ;;  %p326_p3 = scmp.lt.s32.totalorder %s174_s12, %s174_s12 }
  0x29   :  { %241 = vmatprep.subr.bf16.mxu0 %v240_v3  ;;  %v248_v8 = vpack.c.bf16 %v50_v7, %v49_v6  ;;  %v51_v10 = vld [vmem:[#allocation6 + $0x30] sm:$0xff]  ;;  %237 = vmatprep.mubr.f32.mxu0 %v43_v9  ;;  %v53_v13 = vld [vmem:[#allocation6 + $0x40] sm:$0xff]  ;;  %v54_v14 = vld [vmem:[#allocation6 + $0x48] sm:$0xff]  ;;  %p322_p2 = scmp.ne.s32.totalorder %s174_s12, %s321_s13  ;;  %p327_p4 = scmp.lt.s32.totalorder %s321_s13, %s321_s13 }
  0x2a   :  { %243 = vmatpush3.bf16.msra.mxu0 %v240_v3  ;;  %v252_v12 = vpack.c.bf16 %v52_v11, %v51_v10  ;;  %v256_v15 = vpack.c.bf16 %v54_v14, %v53_v13  ;;  %v55_v16 = vld [vmem:[#allocation6 + $0x50] sm:$0xff]  ;;  %v56_v17 = vld [vmem:[#allocation6 + $0x58] sm:$0xff]  ;;  %v57_v19 = vld [vmem:[#allocation6 + $0x60] sm:$0xff] }
  0x2b   :  { %245 = vmatprep.subr.bf16.mxu0 %v244_v5  ;;  %v260_v18 = vpack.c.bf16 %v56_v17, %v55_v16  ;;  %v58_v20 = vld [vmem:[#allocation6 + $0x68] sm:$0xff]  ;;  %v59_v22 = vld [vmem:[#allocation6 + $0x70] sm:$0xff]  ;;  %v60_v23 = vld [vmem:[#allocation6 + $0x78] sm:$0xff]  ;;  %p328_p5 = por %p327_p4, %p326_p3 }
  0x2c   :  { %v264_v21 = vpack.c.bf16 %v58_v20, %v57_v19  ;;  %v268_v24 = vpack.c.bf16 %v60_v23, %v59_v22  ;;  %v44_v25 = vld [vmem:[#allocation3 + $0x8] sm:$0xff]  ;;  %v186_v26 = vld [vmem:[%s424_s2] ss:$0 sm:$0xff] }
  0x2d   :  { %p329_p6 = pnand %p328_p5, %p322_p2 }
  0x2e   :  { %247 = vmatpush3.bf16.msra.mxu0 %v244_v5 }
  0x2f   :  { %249 = vmatprep.subr.bf16.mxu0 %v248_v8 }
  0x32   :  { %251 = vmatpush3.bf16.msra.mxu0 %v248_v8 }
  0x33   :  { %253 = vmatprep.subr.bf16.mxu0 %v252_v12 }
  0x36   :  { %255 = vmatpush3.bf16.msra.mxu0 %v252_v12 }
  0x37   :  { %257 = vmatprep.subr.bf16.mxu0 %v256_v15 }
  0x3a   :  { %259 = vmatpush3.bf16.msra.mxu0 %v256_v15 }
  0x3b   :  { %261 = vmatprep.subr.bf16.mxu0 %v260_v18 }
  0x3e   :  { %263 = vmatpush3.bf16.msra.mxu0 %v260_v18 }
  0x3f   :  { %265 = vmatprep.subr.bf16.mxu0 %v264_v21 }
  0x42   :  { %267 = vmatpush3.bf16.msra.mxu0 %v264_v21 }
  0x43   :  { %269 = vmatprep.subr.bf16.mxu0 %v268_v24 }
  0x46   :  { %271 = vmatpush3.bf16.msra.mxu0 %v268_v24 }
  0x49   :  { %238 = vmatmul.mubr.f32.vlgmr.msra.gmra.mrb[0].mxu0 %v44_v25 }
 0x11c   :  { %v239_v27 = vpop.f32.mrb[0].mxu0 }
 0x11d   :  { %v165_v28 = vadd.f32 %v239_v27, %v186_v26  ;;  %v127_v29 = vpop.f32.mrb[1].mxu0 }
 0x11e   :  { %v164_v30 = vadd.f32 %v186_v26, %v127_v29 }
 0x11f   :  { %167 = vst [vmem:[#allocation8 + $0x8] sm:$0xff] %v165_v28 }
 0x120   :  { %166 = vst [vmem:[#allocation8] sm:$0xff] %v164_v30 }
 0x121   :  { %332 = shalt.err (!%p329_p6)
}
 0x122   :  { %s333_s2 = scalar_lea.hbm %s425_s3, 256 }
 0x123   :  { %p334_p7 = scmp.ne.s32.totalorder %s425_s3, %s333_s2  ;;  %p337_p8 = scmp.lt.u32.totalorder %s333_s2, %s425_s3 }
 0x125   :  { %p339_p9 = pnand %p337_p8, %p334_p7 }
 0x127   :  { %342 = shalt.err (!%p339_p9)
}
 0x128   :  { %179 = dma.vmem_to_hbm [thread:$0]  %s174_s12, 256, %s425_s3, [#allocation5], %s350_s22, %s350_s22, %s351_s23  }
 0x129   :  { %347 = dma.done.wait [#allocation5], 256  }
 0x12a   :  { %348 = vsyncadd [#allocation5], 4294967040 }
 0x12b   :  { %183 = vsyncpa [#allocation4], 1 }
 0x12c   :  { %184 = vsyncpa [#allocation7], 1 }
 0x12d   :  { %185 = vsyncpa [#allocation5], 1 }

</bundles_post_ra>
